<compile_context>
chip_gen: v5e
topology: v5e:2x2
jax: 0.10.0
libtpu: 0.0.40
codegen_flags: <defaults>
</compile_context>

<pallas_src>
import functools

import jax
import jax.numpy as jnp
from jax.experimental import pallas as pl
from jax.experimental.pallas import tpu as pltpu


def _round_up(v, m):
    return ((v + m - 1) // m) * m


def _vmem_budget_bytes():
    """Generation-aware VMEM budget (leave headroom for compiler scratch)."""
    cap = None
    try:
        cap = pltpu.get_tpu_info().vmem_capacity_bytes
    except Exception:
        cap = None
    if not cap:
        cap = 64 << 20                       # conservative default (v7x physical VMEM)
    return min(int(cap) * 3 // 4, 100 << 20)  # ~48 MiB on v7x, ~96 MiB on v5e/v6e


def pack_params(W, b, *, compute_dtype=jnp.float32):
    """Pack (mt, d, my) weights / (mt, my) biases into dense lane layout.

    Hoisted out of the per-call path so it can be done once and reused across calls.
    Returns (W_all (d, cp), b_all (1, cp) f32, G or None, meta dict).
    """
    mt, d, my = W.shape
    assert b.shape == (mt, my)
    cp = _round_up(mt * my, 128)             # dense-packed class columns, lane-aligned total
    my_p = _round_up(my, 128)                # lane-dense output width per row
    aligned = (my % 128 == 0)                # task offsets k*my are lane-aligned

    # W_all[:, k*my + j] = W[k, :, j]
    W_all = jnp.transpose(W, (1, 0, 2)).reshape(d, mt * my)
    W_all = jnp.pad(W_all, ((0, 0), (0, cp - mt * my))).astype(compute_dtype)
    b_all = jnp.pad(b.reshape(1, mt * my), ((0, 0), (0, cp - mt * my))).astype(jnp.float32)

    if aligned:
        G = None                              # compaction via aligned lane-slice adds
    else:
        # 0/1 gather matrix: G[k*my + j, j] = 1  ->  (zeroed @ G)[i, j] = logits[i, t_i*my + j]
        src = jax.lax.broadcasted_iota(jnp.int32, (cp, my_p), 0)
        dst = jax.lax.broadcasted_iota(jnp.int32, (cp, my_p), 1)
        G = ((src % my == dst) & (src < mt * my) & (dst < my)).astype(jnp.float32)

    meta = dict(mt=mt, d=d, my=my, my_p=my_p, cp=cp, aligned=aligned,
                compute_dtype=compute_dtype)
    return W_all, b_all, G, meta


def _multi_softmax_kernel(*refs, mt, my, my_p, cp, log, aligned):
    if aligned:
        t_ref, x_ref, w_ref, b_ref, o_ref = refs
        g_ref = None
    else:
        t_ref, x_ref, w_ref, b_ref, g_ref, o_ref = refs
    bn = x_ref.shape[0]

    # One fused MXU matmul over all tasks' densely-packed class columns; f32 accumulation.
    logits = jnp.dot(x_ref[...], w_ref[...],
                     preferred_element_type=jnp.float32) + b_ref[...]        # (bn, cp) f32

    # Per-row task select as a lane mask (one subtract + one unsigned compare):
    # task t owns lanes [t*my, t*my + my).
    t = t_ref[...]                                                           # (bn, 1) int32
    lo = t * my
    col = jax.lax.broadcasted_iota(jnp.int32, (bn, cp), 1)
    sel = (col - lo).astype(jnp.uint32) < jnp.uint32(my)
    zeroed = jnp.where(sel, logits, 0.0)                                     # (bn, cp)

    # Compact to (bn, my_p) BEFORE the softmax -- only the selected group is nonzero per row.
    if aligned:
        # my is a multiple of 128 (my_p == my): groups sit on aligned lane slices.
        compact = zeroed[:, 0:my_p]
        for k in range(1, mt):                                   # mt small & static: unrolled
            compact = compact + zeroed[:, k * my_p:(k + 1) * my_p]
    else:
        # Tiny 0/1 gather matmul on the MXU (huge slack vs. the VPU/EUP savings).
        compact = jnp.dot(zeroed, g_ref[...], preferred_element_type=jnp.float32)

    # Numerically-stable softmax over my_p lanes only; static tail mask for lanes [my, my_p).
    col2 = jax.lax.broadcasted_iota(jnp.int32, (bn, my_p), 1)
    valid = col2 < my
    masked = jnp.where(valid, compact, -jnp.inf)
    m = jnp.max(masked, axis=-1, keepdims=True)                              # (bn, 1)
    shifted = masked - m                                                     # -inf in tail
    e = jnp.exp(shifted)                                                     # exactly 0 in tail
    s = jnp.sum(e, axis=-1, keepdims=True)                                   # (bn, 1), >= 1

    if log:
        # Tail lanes are stored as 0 (not -inf); the wrapper slices [:, :my].
        vals = jnp.where(valid, shifted - jnp.log(s), 0.0)
    else:
        inv = pl.reciprocal(s, approx=True)                  # EUP slot, VPU stays free
        inv = inv * (2.0 - s * inv)                          # one Newton step -> ~f32 exact
        vals = e * inv

    o_ref[...] = vals                                        # lane-dense (bn, my_p) store


def _build_call(kernel, Np, bn, d, cp, my_p, has_gather, vmem_budget, single_buffer):
    res_kw = dict(pipeline_mode=pl.Buffered(1)) if single_buffer else {}
    in_specs = [
        pl.BlockSpec((bn, 1), lambda i: (i, 0)),                 # t   (double-buffered tile)
        pl.BlockSpec((bn, d), lambda i: (i, 0)),                 # x   (double-buffered tile)
        pl.BlockSpec((d, cp), lambda i: (0, 0), **res_kw),       # W_all (resident, DMA'd once)
        pl.BlockSpec((1, cp), lambda i: (0, 0), **res_kw),       # b_all (resident)
    ]
    if has_gather:
        in_specs.append(pl.BlockSpec((cp, my_p), lambda i: (0, 0), **res_kw))  # gather matrix
    return pl.pallas_call(
        kernel,
        out_shape=jax.ShapeDtypeStruct((Np, my_p), jnp.float32),
        grid_spec=pltpu.PrefetchScalarGridSpec(
            num_scalar_prefetch=0,
            grid=(Np // bn,),
            in_specs=in_specs,
            out_specs=pl.BlockSpec((bn, my_p), lambda i: (i, 0)),
        ),
        compiler_params=pltpu.CompilerParams(
            dimension_semantics=("parallel",),     # shard row tiles across TCs (v7x megacore)
            vmem_limit_bytes=int(vmem_budget),
        ),
    )


def multi_softmax_regression(x, t, W, b, *, log=False, block_n=512,
                             compute_dtype=jnp.float32, packed=None):
    """x: (N, d), t: (N,) int, W: (mt, d, my) (= theta[k].T), b: (mt, my) -> (N, my) f32."""
    N, d = x.shape
    mt, d2, my = W.shape
    assert d2 == d and b.shape == (mt, my)

    if packed is None:
        packed = pack_params(W, b, compute_dtype=compute_dtype)
    W_all, b_all, G, meta = packed
    my_p, cp, aligned = meta["my_p"], meta["cp"], meta["aligned"]
    dt_size = jnp.dtype(compute_dtype).itemsize

    # --- Row-tile size from an explicit VMEM budget ---------------------------------------
    budget = _vmem_budget_bytes()
    resident = d * cp * dt_size + cp * 4 + (0 if aligned else cp * my_p * 4)
    per_row = 2 * (d * dt_size + 4 + my_p * 4)        # double-buffered x / t / out tiles
    per_row += 3 * cp * 4 + 5 * my_p * 4              # live f32 temps (logits/zeroed + softmax)
    avail = max(budget - resident - (2 << 20), per_row)
    bn = max(8, min(block_n, (avail // per_row) // 8 * 8))
    if N > 8:                                         # keep >=2 grid steps for megacore
        bn = min(bn, _round_up((N + 1) // 2, 8))
    bn = max(8, (bn // 8) * 8)
    Np = _round_up(N, bn)

    x_p = jnp.pad(x, ((0, Np - N), (0, 0))).astype(compute_dtype)
    t_p = jnp.pad(t.astype(jnp.int32), (0, Np - N)).reshape(Np, 1)   # padded rows -> task 0

    kernel = functools.partial(_multi_softmax_kernel, mt=mt, my=my, my_p=my_p, cp=cp,
                               log=log, aligned=aligned)
    operands = (t_p, x_p, W_all, b_all) + (() if aligned else (G,))

    try:
        call = _build_call(kernel, Np, bn, d, cp, my_p, not aligned, budget,
                           single_buffer=True)
        out = call(*operands)
    except Exception:
        # Fallback: default double-buffered resident operands (functionally identical).
        call = _build_call(kernel, Np, bn, d, cp, my_p, not aligned, budget,
                           single_buffer=False)
        out = call(*operands)

    return out[:N, :my]


def _reference(x, t, W, b, log=False):
    # Pure-JAX reference matching the PyTorch forward.
    logits = jnp.einsum("nd,ndm->nm", x, W[t]) + b[t]
    if log:
        return jax.nn.log_softmax(logits, axis=1)
    return jax.nn.softmax(logits, axis=1)


if __name__ == "__main__":
    # Small shapes consistent with the module: N samples of dim d, mt tasks, my classes.
    N, d, mt, my = 16, 32, 4, 8

    key = jax.random.PRNGKey(0)
    kx, kt, kw, kb = jax.random.split(key, 4)
    x = jax.random.normal(kx, (N, d), dtype=jnp.float32)
    t = jax.random.randint(kt, (N,), 0, mt, dtype=jnp.int32)
    W = 0.1 * jax.random.normal(kw, (mt, d, my), dtype=jnp.float32)   # = theta[k].T
    b = 0.1 * jax.random.normal(kb, (mt, my), dtype=jnp.float32)

    # f32 path: softmax and log_softmax.
    out = jax.block_until_ready(multi_softmax_regression(x, t, W, b, log=False))
    ref = _reference(x, t, W, b, log=False)
    assert out.shape == (N, my)
    assert jnp.allclose(out, ref, atol=1e-4, rtol=1e-4), "softmax mismatch vs reference"

    out_log = jax.block_until_ready(multi_softmax_regression(x, t, W, b, log=True))
    ref_log = _reference(x, t, W, b, log=True)
    assert jnp.allclose(out_log, ref_log, atol=1e-4, rtol=1e-4), "log_softmax mismatch"

    # bf16 MXU operands (f32 accumulation + f32 softmax) -- fine on v5e/v6e/v7x.
    out_bf16 = jax.block_until_ready(
        multi_softmax_regression(x, t, W, b, log=False, compute_dtype=jnp.bfloat16))
    assert jnp.allclose(out_bf16, ref, atol=2e-2, rtol=2e-2), "bf16 softmax mismatch"

    print("KERNEL_OK")
</pallas_src>

<mosaic_0001>
module attributes {stable_mosaic.version = 11 : i64} {
  func.func @_multi_softmax_kernel(%arg0: i32, %arg1: memref<8x1xi32, #tpu.memory_space<vmem>>, %arg2: memref<8x32xf32, #tpu.memory_space<vmem>>, %arg3: memref<32x128xf32, #tpu.memory_space<vmem>>, %arg4: memref<1x128xf32, #tpu.memory_space<vmem>>, %arg5: memref<128x128xf32, #tpu.memory_space<vmem>>, %arg6: memref<8x128xf32, #tpu.memory_space<vmem>>) attributes {dimension_semantics = [#tpu.dimension_semantics<parallel>], iteration_bounds = array<i64: 2>, scalar_prefetch = 0 : i64, scratch_operands = 0 : i64, tpu.core_type = #tpu.core_type<tc>, window_params = [{transform_indices = @transform_0, window_bounds = array<i64: 8, 1>}, {transform_indices = @transform_1, window_bounds = array<i64: 8, 32>}, {pipeline_mode = #tpu.pipeline_mode<synchronous>, transform_indices = @transform_2, window_bounds = array<i64: 32, 128>}, {pipeline_mode = #tpu.pipeline_mode<synchronous>, transform_indices = @transform_3, window_bounds = array<i64: 1, 128>}, {pipeline_mode = #tpu.pipeline_mode<synchronous>, transform_indices = @transform_4, window_bounds = array<i64: 128, 128>}, {transform_indices = @transform_5, window_bounds = array<i64: 8, 128>}]} {
    %c0 = arith.constant 0 : index
    %c0_0 = arith.constant 0 : index
    %0 = vector.load %arg2[%c0, %c0_0] : memref<8x32xf32, #tpu.memory_space<vmem>>, vector<8x32xf32>
    %c0_1 = arith.constant 0 : index
    %c0_2 = arith.constant 0 : index
    %1 = vector.load %arg3[%c0_1, %c0_2] : memref<32x128xf32, #tpu.memory_space<vmem>>, vector<32x128xf32>
    %cst = arith.constant dense<0.000000e+00> : vector<8x128xf32>
    %2 = tpu.matmul %0, %1, %cst {dimension_numbers = #tpu.dot_dimension_numbers<[1], [0], [0], [1], [0, 0, 1, 1], [], []>} : vector<8x32xf32>, vector<32x128xf32>, vector<8x128xf32> -> vector<8x128xf32>
    %c0_3 = arith.constant 0 : index
    %c0_4 = arith.constant 0 : index
    %3 = vector.load %arg4[%c0_3, %c0_4] : memref<1x128xf32, #tpu.memory_space<vmem>>, vector<1x128xf32>
    %4 = vector.broadcast %3 : vector<1x128xf32> to vector<8x128xf32>
    %5 = arith.addf %2, %4 : vector<8x128xf32>
    %c0_5 = arith.constant 0 : index
    %c0_6 = arith.constant 0 : index
    %6 = vector.load %arg1[%c0_5, %c0_6] : memref<8x1xi32, #tpu.memory_space<vmem>>, vector<8x1xi32>
    %c8_i32 = arith.constant 8 : i32
    %7 = vector.broadcast %c8_i32 : i32 to vector<8x1xi32>
    %8 = arith.muli %6, %7 : vector<8x1xi32>
    %9 = tpu.iota {dimensions = array<i32: 1>} : vector<8x128xi32>
    %10 = vector.broadcast %8 : vector<8x1xi32> to vector<8x128xi32>
    %11 = arith.subi %9, %10 : vector<8x128xi32>
    %c8_i32_7 = arith.constant 8 : i32
    %12 = vector.broadcast %c8_i32_7 : i32 to vector<8x128xi32>
    %13 = arith.cmpi ult, %11, %12 : vector<8x128xi32>
    %cst_8 = arith.constant 0.000000e+00 : f32
    %14 = vector.broadcast %cst_8 : f32 to vector<8x128xf32>
    %15 = arith.select %13, %5, %14 : vector<8x128xi1>, vector<8x128xf32>
    %c0_9 = arith.constant 0 : index
    %c0_10 = arith.constant 0 : index
    %16 = vector.load %arg5[%c0_9, %c0_10] : memref<128x128xf32, #tpu.memory_space<vmem>>, vector<128x128xf32>
    %cst_11 = arith.constant dense<0.000000e+00> : vector<8x128xf32>
    %17 = tpu.matmul %15, %16, %cst_11 {dimension_numbers = #tpu.dot_dimension_numbers<[1], [0], [0], [1], [0, 0, 1, 1], [], []>} : vector<8x128xf32>, vector<128x128xf32>, vector<8x128xf32> -> vector<8x128xf32>
    %18 = tpu.iota {dimensions = array<i32: 1>} : vector<8x128xi32>
    %c8_i32_12 = arith.constant 8 : i32
    %19 = vector.broadcast %c8_i32_12 : i32 to vector<8x128xi32>
    %20 = arith.cmpi slt, %18, %19 : vector<8x128xi32>
    %cst_13 = arith.constant 0xFF800000 : f32
    %21 = vector.broadcast %cst_13 : f32 to vector<8x128xf32>
    %22 = arith.select %20, %17, %21 : vector<8x128xi1>, vector<8x128xf32>
    %cst_14 = arith.constant dense<0xFF800000> : vector<8xf32>
    %23 = vector.multi_reduction <maximumf>, %22, %cst_14 [1] : vector<8x128xf32> to vector<8xf32>
    %24 = vector.shape_cast %23 : vector<8xf32> to vector<8x1xf32>
    %25 = vector.broadcast %24 : vector<8x1xf32> to vector<8x128xf32>
    %26 = arith.subf %22, %25 : vector<8x128xf32>
    %27 = math.exp %26 : vector<8x128xf32>
    %cst_15 = arith.constant dense<0.000000e+00> : vector<8xf32>
    %28 = vector.multi_reduction <add>, %27, %cst_15 [1] : vector<8x128xf32> to vector<8xf32>
    %29 = vector.shape_cast %28 : vector<8xf32> to vector<8x1xf32>
    %30 = tpu.reciprocal %29 {approx = true} : vector<8x1xf32> -> vector<8x1xf32>
    %31 = arith.mulf %29, %30 : vector<8x1xf32>
    %cst_16 = arith.constant 2.000000e+00 : f32
    %32 = vector.broadcast %cst_16 : f32 to vector<8x1xf32>
    %33 = arith.subf %32, %31 : vector<8x1xf32>
    %34 = arith.mulf %30, %33 : vector<8x1xf32>
    %35 = vector.broadcast %34 : vector<8x1xf32> to vector<8x128xf32>
    %36 = arith.mulf %27, %35 : vector<8x128xf32>
    %c0_17 = arith.constant 0 : index
    %c0_18 = arith.constant 0 : index
    %37 = vector.load %arg6[%c0_17, %c0_18] : memref<8x128xf32, #tpu.memory_space<vmem>>, vector<8x128xf32>
    tpu.vector_store %arg6[%c0_17, %c0_18], %36 {strides = array<i32>} : memref<8x128xf32, #tpu.memory_space<vmem>>, vector<8x128xf32>,
    return
  }
  func.func @transform_0(%arg0: i32) -> (i32, i32) {
    %c0_i32 = arith.constant 0 : i32
    %c0_i32_0 = arith.constant 0 : i32
    return %arg0, %c0_i32 : i32, i32
  }
  func.func @transform_1(%arg0: i32) -> (i32, i32) {
    %c0_i32 = arith.constant 0 : i32
    %c0_i32_0 = arith.constant 0 : i32
    return %arg0, %c0_i32 : i32, i32
  }
  func.func @transform_2(%arg0: i32) -> (i32, i32) {
    %c0_i32 = arith.constant 0 : i32
    %c0_i32_0 = arith.constant 0 : i32
    %c0_i32_1 = arith.constant 0 : i32
    return %c0_i32, %c0_i32_0 : i32, i32
  }
  func.func @transform_3(%arg0: i32) -> (i32, i32) {
    %c0_i32 = arith.constant 0 : i32
    %c0_i32_0 = arith.constant 0 : i32
    %c0_i32_1 = arith.constant 0 : i32
    return %c0_i32, %c0_i32_0 : i32, i32
  }
  func.func @transform_4(%arg0: i32) -> (i32, i32) {
    %c0_i32 = arith.constant 0 : i32
    %c0_i32_0 = arith.constant 0 : i32
    %c0_i32_1 = arith.constant 0 : i32
    return %c0_i32, %c0_i32_0 : i32, i32
  }
  func.func @transform_5(%arg0: i32) -> (i32, i32) {
    %c0_i32 = arith.constant 0 : i32
    %c0_i32_0 = arith.constant 0 : i32
    return %arg0, %c0_i32 : i32, i32
  }
}

module attributes {stable_mosaic.version = 11 : i64} {
  func.func @_multi_softmax_kernel(%arg0: i32, %arg1: memref<8x1xi32, #tpu.memory_space<vmem>>, %arg2: memref<8x32xf32, #tpu.memory_space<vmem>>, %arg3: memref<32x128xf32, #tpu.memory_space<vmem>>, %arg4: memref<1x128xf32, #tpu.memory_space<vmem>>, %arg5: memref<128x128xf32, #tpu.memory_space<vmem>>, %arg6: memref<8x128xf32, #tpu.memory_space<vmem>>) attributes {dimension_semantics = [#tpu.dimension_semantics<parallel>], iteration_bounds = array<i64: 2>, scalar_prefetch = 0 : i64, scratch_operands = 0 : i64, tpu.core_type = #tpu.core_type<tc>, window_params = [{transform_indices = @transform_0, window_bounds = array<i64: 8, 1>}, {transform_indices = @transform_1, window_bounds = array<i64: 8, 32>}, {pipeline_mode = #tpu.pipeline_mode<synchronous>, transform_indices = @transform_2, window_bounds = array<i64: 32, 128>}, {pipeline_mode = #tpu.pipeline_mode<synchronous>, transform_indices = @transform_3, window_bounds = array<i64: 1, 128>}, {pipeline_mode = #tpu.pipeline_mode<synchronous>, transform_indices = @transform_4, window_bounds = array<i64: 128, 128>}, {transform_indices = @transform_5, window_bounds = array<i64: 8, 128>}]} {
    %c0 = arith.constant 0 : index
    %c0_0 = arith.constant 0 : index
    %0 = vector.load %arg2[%c0, %c0_0] : memref<8x32xf32, #tpu.memory_space<vmem>>, vector<8x32xf32>
    %c0_1 = arith.constant 0 : index
    %c0_2 = arith.constant 0 : index
    %1 = vector.load %arg3[%c0_1, %c0_2] : memref<32x128xf32, #tpu.memory_space<vmem>>, vector<32x128xf32>
    %cst = arith.constant dense<0.000000e+00> : vector<8x128xf32>
    %2 = tpu.matmul %0, %1, %cst {dimension_numbers = #tpu.dot_dimension_numbers<[1], [0], [0], [1], [0, 0, 1, 1], [], []>} : vector<8x32xf32>, vector<32x128xf32>, vector<8x128xf32> -> vector<8x128xf32>
    %c0_3 = arith.constant 0 : index
    %c0_4 = arith.constant 0 : index
    %3 = vector.load %arg4[%c0_3, %c0_4] : memref<1x128xf32, #tpu.memory_space<vmem>>, vector<1x128xf32>
    %4 = vector.broadcast %3 : vector<1x128xf32> to vector<8x128xf32>
    %5 = arith.addf %2, %4 : vector<8x128xf32>
    %c0_5 = arith.constant 0 : index
    %c0_6 = arith.constant 0 : index
    %6 = vector.load %arg1[%c0_5, %c0_6] : memref<8x1xi32, #tpu.memory_space<vmem>>, vector<8x1xi32>
    %c8_i32 = arith.constant 8 : i32
    %7 = vector.broadcast %c8_i32 : i32 to vector<8x1xi32>
    %8 = arith.muli %6, %7 : vector<8x1xi32>
    %9 = tpu.iota {dimensions = array<i32: 1>} : vector<8x128xi32>
    %10 = vector.broadcast %8 : vector<8x1xi32> to vector<8x128xi32>
    %11 = arith.subi %9, %10 : vector<8x128xi32>
    %c8_i32_7 = arith.constant 8 : i32
    %12 = vector.broadcast %c8_i32_7 : i32 to vector<8x128xi32>
    %13 = arith.cmpi ult, %11, %12 : vector<8x128xi32>
    %cst_8 = arith.constant 0.000000e+00 : f32
    %14 = vector.broadcast %cst_8 : f32 to vector<8x128xf32>
    %15 = arith.select %13, %5, %14 : vector<8x128xi1>, vector<8x128xf32>
    %c0_9 = arith.constant 0 : index
    %c0_10 = arith.constant 0 : index
    %16 = vector.load %arg5[%c0_9, %c0_10] : memref<128x128xf32, #tpu.memory_space<vmem>>, vector<128x128xf32>
    %cst_11 = arith.constant dense<0.000000e+00> : vector<8x128xf32>
    %17 = tpu.matmul %15, %16, %cst_11 {dimension_numbers = #tpu.dot_dimension_numbers<[1], [0], [0], [1], [0, 0, 1, 1], [], []>} : vector<8x128xf32>, vector<128x128xf32>, vector<8x128xf32> -> vector<8x128xf32>
    %18 = tpu.iota {dimensions = array<i32: 1>} : vector<8x128xi32>
    %c8_i32_12 = arith.constant 8 : i32
    %19 = vector.broadcast %c8_i32_12 : i32 to vector<8x128xi32>
    %20 = arith.cmpi slt, %18, %19 : vector<8x128xi32>
    %cst_13 = arith.constant 0xFF800000 : f32
    %21 = vector.broadcast %cst_13 : f32 to vector<8x128xf32>
    %22 = arith.select %20, %17, %21 : vector<8x128xi1>, vector<8x128xf32>
    %cst_14 = arith.constant dense<0xFF800000> : vector<8xf32>
    %23 = vector.multi_reduction <maximumf>, %22, %cst_14 [1] : vector<8x128xf32> to vector<8xf32>
    %24 = vector.shape_cast %23 : vector<8xf32> to vector<8x1xf32>
    %25 = vector.broadcast %24 : vector<8x1xf32> to vector<8x128xf32>
    %26 = arith.subf %22, %25 : vector<8x128xf32>
    %27 = math.exp %26 : vector<8x128xf32>
    %cst_15 = arith.constant dense<0.000000e+00> : vector<8xf32>
    %28 = vector.multi_reduction <add>, %27, %cst_15 [1] : vector<8x128xf32> to vector<8xf32>
    %29 = vector.shape_cast %28 : vector<8xf32> to vector<8x1xf32>
    %30 = tpu.reciprocal %29 {approx = true} : vector<8x1xf32> -> vector<8x1xf32>
    %31 = arith.mulf %29, %30 : vector<8x1xf32>
    %cst_16 = arith.constant 2.000000e+00 : f32
    %32 = vector.broadcast %cst_16 : f32 to vector<8x1xf32>
    %33 = arith.subf %32, %31 : vector<8x1xf32>
    %34 = arith.mulf %30, %33 : vector<8x1xf32>
    %35 = vector.broadcast %34 : vector<8x1xf32> to vector<8x128xf32>
    %36 = arith.mulf %27, %35 : vector<8x128xf32>
    %c0_17 = arith.constant 0 : index
    %c0_18 = arith.constant 0 : index
    %37 = vector.load %arg6[%c0_17, %c0_18] : memref<8x128xf32, #tpu.memory_space<vmem>>, vector<8x128xf32>
    tpu.vector_store %arg6[%c0_17, %c0_18], %36 {strides = array<i32>} : memref<8x128xf32, #tpu.memory_space<vmem>>, vector<8x128xf32>,
    return
  }
  func.func @transform_0(%arg0: i32) -> (i32, i32) {
    %c0_i32 = arith.constant 0 : i32
    %c0_i32_0 = arith.constant 0 : i32
    return %arg0, %c0_i32 : i32, i32
  }
  func.func @transform_1(%arg0: i32) -> (i32, i32) {
    %c0_i32 = arith.constant 0 : i32
    %c0_i32_0 = arith.constant 0 : i32
    return %arg0, %c0_i32 : i32, i32
  }
  func.func @transform_2(%arg0: i32) -> (i32, i32) {
    %c0_i32 = arith.constant 0 : i32
    %c0_i32_0 = arith.constant 0 : i32
    %c0_i32_1 = arith.constant 0 : i32
    return %c0_i32, %c0_i32_0 : i32, i32
  }
  func.func @transform_3(%arg0: i32) -> (i32, i32) {
    %c0_i32 = arith.constant 0 : i32
    %c0_i32_0 = arith.constant 0 : i32
    %c0_i32_1 = arith.constant 0 : i32
    return %c0_i32, %c0_i32_0 : i32, i32
  }
  func.func @transform_4(%arg0: i32) -> (i32, i32) {
    %c0_i32 = arith.constant 0 : i32
    %c0_i32_0 = arith.constant 0 : i32
    %c0_i32_1 = arith.constant 0 : i32
    return %c0_i32, %c0_i32_0 : i32, i32
  }
  func.func @transform_5(%arg0: i32) -> (i32, i32) {
    %c0_i32 = arith.constant 0 : i32
    %c0_i32_0 = arith.constant 0 : i32
    return %arg0, %c0_i32 : i32, i32
  }
}

</mosaic_0001>

<bundles_post_ra>
// kernel: tpu_custom_call.1
= control target key start
LH: loop header
LB: loop body
LE: loop exit
PB: predicated region body
PF: predicated region fallthrough
CT: control target
= control target key end

     0   :  { %10 = vsyncpa [#allocation3], 0  ;;  %s846_s0 = inlined_call_operand.vmem [shape: s32[16,1], index: 0, kind: input, shape index: {}]   ;;  %s847_s1 = inlined_call_operand.vmem [shape: f32[16,32], index: 1, kind: input, shape index: {}]   ;;  %s848_s2 = inlined_call_operand.hbm [shape: f32[32,128], index: 2, kind: input, shape index: {}]   ;;  %s849_s3 = inlined_call_operand.vmem [shape: f32[1,128], index: 3, kind: input, shape index: {}]   ;;  %s850_s4 = inlined_call_operand.hbm [shape: f32[128,128], index: 4, kind: input, shape index: {}]   ;;  %s851_s5 = inlined_call_operand.hbm [shape: f32[16,128], index: 5, kind: output, shape index: {}]  }
   0x1   :  { %11 = vsyncpa [#allocation6], 0 }
   0x2   :  { %12 = vsyncpa [#allocation4], 0 }
   0x3   :  { %14 = vsyncpa [#allocation4 + $0x1], 0  ;;  %s730_s18 = smov 0   ;;  %s732_s19 = smov 0  }
   0x4   :  { %s734_s20 = smov 0   ;;  %s736_s21 = smov 0  }
   0x5 LB: > { %s751_s22 = sadd.s32 4294967295, %s693_s21   ;;  %s476_s23 = sadd.s32 4294967294, %s693_s21   ;;  %s693_s21 = sphi %s736_s21, %s858_s21   ;;  %s689_s20 = sphi %s734_s20, %s857_s20   ;;  %s685_s19 = sphi %s732_s19, %s856_s19   ;;  %s681_s18 = sphi %s730_s18, %s855_s18  }
   0x6   : > { %s755_s24 = sadd.s32 1, %s693_s21   ;;  %s142_s25 = sadd.s32 1, %s689_s20 }
   0x7   : > { %s139_s26 = ssub.s32 %s693_s21, %s755_s24  ;;  %p152_p0 = scmp.ne.s32.totalorder %s689_s20, %s685_s19 }
   0x8   : > { %p140_p1 = scmp.eq.s32.totalorder %s139_s26, 0  ;;  %p153_p2 = scmp.eq.s32.totalorder %s751_s22, 1 }
   0x9   : > { %p158_p3 = scmp.ne.s32.totalorder %s685_s19, %s681_s18  ;;  %p159_p4 = scmp.eq.s32.totalorder %s476_s23, 1 }
   0xa   : > { %s766_s27 = scalar_select %p140_p1, %s689_s20, %s142_s25  }
   0xb   : > { %p768_p5 = por %p153_p2, %p152_p0  ;;  %p772_p6 = por %p159_p4, %p158_p3 }
   0xc   : > { %p477_p7 = scmp.ge.s32.totalorder %s693_s21, 1  ;;  %p166_p8 = scmp.lt.s32.totalorder %s693_s21, 3 }
   0xd   : > { %p515_p9 = scmp.eq.s32.totalorder %s751_s22, 0  ;;  %s177_s8 = sshll.u32 %s848_s2, 4  ;;  %s178_s8 = int_to_ptr.hbm [resolvable:$true] %s177_s8 }
   0xe   : > { %p779_p10 = pnand %p477_p7, %p166_p8  ;;  %s695_s9 = smov [#allocation2]  }
   0xf   : > { %s179_s10 = sshll.u32 %s695_s9, 4  ;;  %s194_s13 = sshll.u32 %s850_s4, 4  ;;  %s180_s10 = int_to_ptr.vmem [resolvable:$true] %s179_s10  ;;  %s195_s13 = int_to_ptr.hbm [resolvable:$true] %s194_s13 }
  0x10   : > { %p504_p11 = pneg %p779_p10  ;;  %s696_s14 = smov 128  }
  0x11   : > { %s697_s15 = smov 8   ;;  %s698_s16 = smov [#allocation5]  }
  0x12   : > { %p505_p12 = pnand %p515_p9, %p504_p11  ;;  %s196_s17 = sshll.u32 %s698_s16, 4  ;;  %s197_s17 = int_to_ptr.vmem [resolvable:$true] %s196_s17 }
  0x13   : > { %226 = sbr.rel (%p779_p10) target bundleno = 551 (0x227), region = 40 }
  0x14   : > { %507 = dma.hbm_to_vmem [thread:$0]  (!%p505_p12), %s178_s8, 512, %s180_s10, [#allocation3], %s696_s14, %s696_s14, %s697_s15  }
  0x15   : > { %510 = dma.hbm_to_vmem [thread:$0]  (!%p505_p12), %s195_s13, 2048, %s197_s17, [#allocation6], %s696_s14, %s696_s14, %s697_s15  }
  0x18   : > { %668 = dma.done.wait (%p515_p9), [#allocation3], 512  }
  0x19   : > { %670 = vsyncadd (%p515_p9), [#allocation3], 4294966784 }
  0x1a   : > { %672 = dma.done.wait (%p515_p9), [#allocation6], 2048  }
  0x1b   : > { %674 = vsyncadd (%p515_p9), [#allocation6], 4294965248  ;;  %p263_p13 = scmp.lt.s32.totalorder %s751_s22, 1  ;;  %v699_v0 = vmov 0   ;;  %v275_v1 = vld [vmem:[#allocation2 + $0x18] sm:$0xff]  ;;  %v274_v2 = vld [vmem:[#allocation2 + $0x10] sm:$0xff]  ;;  %v306_v24 = vlaneseq }
  0x1c   : > { %557 = vset.pattern.permute.xlu0 %v699_v0  ;;  %296 = vmatpush.msra.mxu0 %v275_v1  ;;  %v273_v4 = vld [vmem:[#allocation2 + $0x8] sm:$0xff]  ;;  %v331_v6 = vld [vmem:[#allocation5 + $0x78] sm:$0xff]  ;;  %v330_v7 = vld [vmem:[#allocation5 + $0x70] sm:$0xff]  ;;  %vm280_vm0 = vcmask 261120   ;;  %s260_s12 = sand.u32 1, %s685_s19   ;;  %s491_s14 = sshll.u32 %s751_s22, 3 }
  0x1d   : > { %s264_s23 = scalar_select %p263_p13, %s751_s22, 1  ;;  %332 = vmatpush.msra.mxu1 %v331_v6  ;;  %v272_v8 = vld [vmem:[#allocation2] sm:$0xff]  ;;  %v329_v9 = vld [vmem:[#allocation5 + $0x68] sm:$0xff]  ;;  %v327_v12 = vld [vmem:[#allocation5 + $0x58] sm:$0xff]  ;;  %v307_v25 = vand.u32 127, %v306_v24 }
  0x1e   : > { %297 = vmatpush.msra.mxu0 %v274_v2  ;;  %v328_v11 = vld [vmem:[#allocation5 + $0x60] sm:$0xff]  ;;  %v326_v13 = vld [vmem:[#allocation5 + $0x50] sm:$0xff]  ;;  %v325_v14 = vld [vmem:[#allocation5 + $0x48] sm:$0xff]  ;;  %s484_s13 = sshll.u32 %s260_s12, 3  ;;  %s378_s17 = scalar_lea.hbm %s851_s5, %s491_s14 }
  0x1f   : > { %s485_s25 = sshll.u32 %s264_s23, 3  ;;  %333 = vmatpush.msra.mxu1 %v330_v7  ;;  %v324_v15 = vld [vmem:[#allocation5 + $0x40] sm:$0xff]  ;;  %v323_v16 = vld [vmem:[#allocation5 + $0x38] sm:$0xff]  ;;  %v322_v17 = vld [vmem:[#allocation5 + $0x30] sm:$0xff]  ;;  %vm352_vm2 = vcmp.lt.s32.totalorder %v307_v25, 8  ;;  %s262_s23 = scalar_lea.vmem [#allocation7], %s484_s13 }
  0x20   : > { %s266_s6 = scalar_lea.vmem %s846_s0, %s485_s25  ;;  %s270_s9 = scalar_lea.vmem %s847_s1, %s485_s25  ;;  %298 = vmatpush.msra.mxu0 %v273_v4  ;;  %v321_v18 = vld [vmem:[#allocation5 + $0x28] sm:$0xff]  ;;  %v320_v19 = vld [vmem:[#allocation5 + $0x20] sm:$0xff]  ;;  %v319_v20 = vld [vmem:[#allocation5 + $0x18] sm:$0xff] }
  0x21   : > { %v304_v3 = vld [vmem:[%s266_s6] sm:$0xff]  ;;  %334 = vmatpush.msra.mxu1 %v329_v9  ;;  %v318_v21 = vld [vmem:[#allocation5 + $0x10] sm:$0xff]  ;;  %v317_v22 = vld [vmem:[#allocation5 + $0x8] sm:$0xff]  ;;  %s380_s25 = sshll.u32 %s262_s23, 4  ;;  %s382_s26 = sshll.u32 %s378_s17, 4  ;;  %s381_s25 = int_to_ptr.vmem [resolvable:$true] %s380_s25  ;;  %s383_s26 = int_to_ptr.hbm [resolvable:$true] %s382_s26 }
  0x22   : > { %v305_v5 = vmul.u32 8, %v304_v3  ;;  %v271_v10 = vld [vmem:[%s270_s9] sm:$0xff]  ;;  %299 = vmatpush.msra.mxu0 %v272_v8  ;;  %s368_s30 = scalar_lea.sflag [#allocation4], %s260_s12  ;;  %s637_s6 = sshra.s32 %s383_s26, 4  ;;  %s638_s6 = int_to_ptr.hbm [resolvable:$true] %s637_s6 }
  0x23   : > { %487 = vmatmul.msk.f32.vlgmr.msra.gmra.mxu0 %vm280_vm0, %v271_v10  ;;  %335 = vmatpush.msra.mxu1 %v328_v11  ;;  %v316_v23 = vld [vmem:[#allocation5] sm:$0xff]  ;;  %s639_s22 = scalar_lea.hbm %s638_s6, 8  ;;  %s643_s9 = scalar_lea.hbm %s851_s5, 16 }
  0x24   : > { %309 = vperm.xlu0 %557, %v305_v5   ;;  %v558_v29 = vld [vmem:[%s849_s3] ss:$0 sm:$0xff]  ;;  %p640_p0 = scmp.ne.s32.totalorder %s638_s6, %s639_s22  ;;  %p644_p3 = scmp.lt.s32.totalorder %s638_s6, %s851_s5 }
  0x25   : > { %336 = vmatpush.msra.mxu1 %v327_v12  ;;  %p645_p4 = scmp.lt.s32.totalorder %s643_s9, %s639_s22 }
  0x26   : > { %p641_p1 = pnand %p640_p0, %p768_p5 }
  0x27   : > { %337 = vmatpush.msra.mxu1 %v326_v13  ;;  %p646_p7 = por %p645_p4, %p644_p3 }
  0x28   : > { %p642_p2 = pneg %p641_p1 }
  0x29   : > { %338 = vmatpush.msra.mxu1 %v325_v14 }
  0x2a   : > { %p647_p8 = pnand %p646_p7, %p642_p2 }
  0x2b   : > { %339 = vmatpush.msra.mxu1 %v324_v15 }
  0x2d   : > { %340 = vmatpush.msra.mxu1 %v323_v16 }
  0x2f   : > { %341 = vmatpush.msra.mxu1 %v322_v17 }
  0x31   : > { %342 = vmatpush.msra.mxu1 %v321_v18 }
  0x33   : > { %343 = vmatpush.msra.mxu1 %v320_v19 }
  0x35   : > { %344 = vmatpush.msra.mxu1 %v319_v20 }
  0x37   : > { %345 = vmatpush.msra.mxu1 %v318_v21 }
  0x39   : > { %346 = vmatpush.msra.mxu1 %v317_v22 }
  0x3b   : > { %347 = vmatpush.msra.mxu1 %v316_v23 }
  0x96   : > { %v310_v26 = vpop.permute.xlu0 %309 }
  0x97   : > { %v311_v27 = vsub.s32 %v307_v25, %v310_v26 }
  0x99   : > { %v488_v28 = vxor.u32 2147483648, %v311_v27 }
  0x9b   : > { %vm314_vm1 = vcmp.lt.s32.totalorder %v488_v28, 2147483656 }
  0xa0   : > { %v301_v30 = vpop.f32.mrf.mxu0 }
  0xa1   : > { %v302_v31 = vadd.f32 %v558_v29, %v301_v30 }
  0xa3   : > { %489 = vmatmul.msk.f32.vlgmr.msra.gmra.mxu1 %vm314_vm1, %v302_v31 }
 0x120   : > { %v349_v32 = vpop.f32.mrf.mxu1 }
 0x121   : > { %v353_v33 = vsel %vm352_vm2, %v349_v32, -inf }
 0x122   : > { %354 = vmax.xlane.f32.xlu0 %v353_v33 }
 0x195   : > { %v355_v34 = vpop.xlane.xlu0 %354 }
 0x196   : > { %v356_v35 = vsub.f32 %v353_v33, %v355_v34 }
 0x198   : > { %v357_v36 = vmul.f32 1.442695, %v356_v35 }
 0x19a   : > { %559 = vpow2.f32 %v357_v36 }
 0x1a0   : > { %v560_v37 = vpop.eup %559 }
 0x1a1   : > { %359 = vadd.xlane.f32.xlu1 %v560_v37 }
 0x214   : > { %v360_v38 = vpop.xlane.xlu1 %359 }
 0x215   : > { %561 = vrcp.f32 %v360_v38 }
 0x21b   : > { %v562_v39 = vpop.eup %561 }
 0x21c   : > { %v362_v40 = vmul.f32 %v562_v39, %v360_v38 }
 0x21e   : > { %v363_v41 = vsub.f32 2.0, %v362_v40 }
 0x220   : > { %v364_v42 = vmul.f32 %v562_v39, %v363_v41 }
 0x222   : > { %v365_v43 = vmul.f32 %v560_v37, %v364_v42 }
 0x224   : > { %366 = vst [vmem:[%s262_s23] sm:$0xff] %v365_v43 }
 0x225   : > { %650 = shalt.err (!%p647_p8)
}
 0x226   : > { %502 = dma.vmem_to_hbm [thread:$0]  (%p768_p5), %s381_s25, 128, %s383_s26, %s368_s30  }
 0x227 PF: > { %p519_p9 = scmp.ge.s32.totalorder %s693_s21, 2  ;;  %s394_s12 = sand.u32 1, %s681_s18  }
 0x228   : > { %s395_s13 = scalar_lea.sflag [#allocation4], %s394_s12 }
 0x229   : > { %p512_p10 = pnand %p519_p9, %p772_p6 }
 0x22b   : > { %p513_p11 = pneg %p512_p10 }
 0x22d   : > { %676 = dma.done.wait (%p513_p11), %s395_s13, 128  }
 0x22e   : > { %678 = vsyncadd (%p513_p11), %s395_s13, 4294967168  ;;  %p17_p12 = scmp.ge.s32.totalorder %s755_s24, 4   ;;  %s855_s18 = smov %s685_s19 }
 0x22f   : > { %s856_s19 = smov %s689_s20  ;;  %s857_s20 = smov %s766_s27 }
 0x230   : > { %s858_s21 = smov %s755_s24  ;;  %19 = sbr.rel (!%p17_p12) target bundleno = 5 (0x5), region = 87 }
 0x235   :  { %401 = vsyncpa [#allocation3], 1 }
 0x236   :  { %403 = vsyncpa [#allocation3 + $0x1], 1 }
 0x237   :  { %404 = vsyncpa [#allocation6], 1 }
 0x238   :  { %405 = vsyncpa [#allocation4], 1 }
 0x239   :  { %407 = vsyncpa [#allocation4 + $0x1], 1 }

// kernel: tpu_custom_call.1
= control target key start
LH: loop header
LB: loop body
LE: loop exit
PB: predicated region body
PF: predicated region fallthrough
CT: control target
= control target key end

     0   :  { %10 = vsyncpa [#allocation3], 0  ;;  %s846_s0 = inlined_call_operand.vmem [shape: s32[16,1], index: 0, kind: input, shape index: {}]   ;;  %s847_s1 = inlined_call_operand.vmem [shape: f32[16,32], index: 1, kind: input, shape index: {}]   ;;  %s848_s2 = inlined_call_operand.hbm [shape: f32[32,128], index: 2, kind: input, shape index: {}]   ;;  %s849_s3 = inlined_call_operand.vmem [shape: f32[1,128], index: 3, kind: input, shape index: {}]   ;;  %s850_s4 = inlined_call_operand.hbm [shape: f32[128,128], index: 4, kind: input, shape index: {}]   ;;  %s851_s5 = inlined_call_operand.hbm [shape: f32[16,128], index: 5, kind: output, shape index: {}]  }
   0x1   :  { %11 = vsyncpa [#allocation6], 0 }
   0x2   :  { %12 = vsyncpa [#allocation4], 0 }
   0x3   :  { %14 = vsyncpa [#allocation4 + $0x1], 0  ;;  %s730_s18 = smov 0   ;;  %s732_s19 = smov 0  }
   0x4   :  { %s734_s20 = smov 0   ;;  %s736_s21 = smov 0  }
   0x5 LB: > { %s751_s22 = sadd.s32 4294967295, %s693_s21   ;;  %s476_s23 = sadd.s32 4294967294, %s693_s21   ;;  %s693_s21 = sphi %s736_s21, %s858_s21   ;;  %s689_s20 = sphi %s734_s20, %s857_s20   ;;  %s685_s19 = sphi %s732_s19, %s856_s19   ;;  %s681_s18 = sphi %s730_s18, %s855_s18  }
   0x6   : > { %s755_s24 = sadd.s32 1, %s693_s21   ;;  %s142_s25 = sadd.s32 1, %s689_s20 }
   0x7   : > { %s139_s26 = ssub.s32 %s693_s21, %s755_s24  ;;  %p152_p0 = scmp.ne.s32.totalorder %s689_s20, %s685_s19 }
   0x8   : > { %p140_p1 = scmp.eq.s32.totalorder %s139_s26, 0  ;;  %p153_p2 = scmp.eq.s32.totalorder %s751_s22, 1 }
   0x9   : > { %p158_p3 = scmp.ne.s32.totalorder %s685_s19, %s681_s18  ;;  %p159_p4 = scmp.eq.s32.totalorder %s476_s23, 1 }
   0xa   : > { %s766_s27 = scalar_select %p140_p1, %s689_s20, %s142_s25  }
   0xb   : > { %p768_p5 = por %p153_p2, %p152_p0  ;;  %p772_p6 = por %p159_p4, %p158_p3 }
   0xc   : > { %p477_p7 = scmp.ge.s32.totalorder %s693_s21, 1  ;;  %p166_p8 = scmp.lt.s32.totalorder %s693_s21, 3 }
   0xd   : > { %p515_p9 = scmp.eq.s32.totalorder %s751_s22, 0  ;;  %s177_s8 = sshll.u32 %s848_s2, 4  ;;  %s178_s8 = int_to_ptr.hbm [resolvable:$true] %s177_s8 }
   0xe   : > { %p779_p10 = pnand %p477_p7, %p166_p8  ;;  %s695_s9 = smov [#allocation2]  }
   0xf   : > { %s179_s10 = sshll.u32 %s695_s9, 4  ;;  %s194_s13 = sshll.u32 %s850_s4, 4  ;;  %s180_s10 = int_to_ptr.vmem [resolvable:$true] %s179_s10  ;;  %s195_s13 = int_to_ptr.hbm [resolvable:$true] %s194_s13 }
  0x10   : > { %p504_p11 = pneg %p779_p10  ;;  %s696_s14 = smov 128  }
  0x11   : > { %s697_s15 = smov 8   ;;  %s698_s16 = smov [#allocation5]  }
  0x12   : > { %p505_p12 = pnand %p515_p9, %p504_p11  ;;  %s196_s17 = sshll.u32 %s698_s16, 4  ;;  %s197_s17 = int_to_ptr.vmem [resolvable:$true] %s196_s17 }
  0x13   : > { %226 = sbr.rel (%p779_p10) target bundleno = 551 (0x227), region = 40 }
  0x14   : > { %507 = dma.hbm_to_vmem [thread:$0]  (!%p505_p12), %s178_s8, 512, %s180_s10, [#allocation3], %s696_s14, %s696_s14, %s697_s15  }
  0x15   : > { %510 = dma.hbm_to_vmem [thread:$0]  (!%p505_p12), %s195_s13, 2048, %s197_s17, [#allocation6], %s696_s14, %s696_s14, %s697_s15  }
  0x18   : > { %668 = dma.done.wait (%p515_p9), [#allocation3], 512  }
  0x19   : > { %670 = vsyncadd (%p515_p9), [#allocation3], 4294966784 }
  0x1a   : > { %672 = dma.done.wait (%p515_p9), [#allocation6], 2048  }
  0x1b   : > { %674 = vsyncadd (%p515_p9), [#allocation6], 4294965248  ;;  %p263_p13 = scmp.lt.s32.totalorder %s751_s22, 1  ;;  %v699_v0 = vmov 0   ;;  %v275_v1 = vld [vmem:[#allocation2 + $0x18] sm:$0xff]  ;;  %v274_v2 = vld [vmem:[#allocation2 + $0x10] sm:$0xff]  ;;  %v306_v24 = vlaneseq }
  0x1c   : > { %557 = vset.pattern.permute.xlu0 %v699_v0  ;;  %296 = vmatpush.msra.mxu0 %v275_v1  ;;  %v273_v4 = vld [vmem:[#allocation2 + $0x8] sm:$0xff]  ;;  %v331_v6 = vld [vmem:[#allocation5 + $0x78] sm:$0xff]  ;;  %v330_v7 = vld [vmem:[#allocation5 + $0x70] sm:$0xff]  ;;  %vm280_vm0 = vcmask 261120   ;;  %s260_s12 = sand.u32 1, %s685_s19   ;;  %s491_s14 = sshll.u32 %s751_s22, 3 }
  0x1d   : > { %s264_s23 = scalar_select %p263_p13, %s751_s22, 1  ;;  %332 = vmatpush.msra.mxu1 %v331_v6  ;;  %v272_v8 = vld [vmem:[#allocation2] sm:$0xff]  ;;  %v329_v9 = vld [vmem:[#allocation5 + $0x68] sm:$0xff]  ;;  %v327_v12 = vld [vmem:[#allocation5 + $0x58] sm:$0xff]  ;;  %v307_v25 = vand.u32 127, %v306_v24 }
  0x1e   : > { %297 = vmatpush.msra.mxu0 %v274_v2  ;;  %v328_v11 = vld [vmem:[#allocation5 + $0x60] sm:$0xff]  ;;  %v326_v13 = vld [vmem:[#allocation5 + $0x50] sm:$0xff]  ;;  %v325_v14 = vld [vmem:[#allocation5 + $0x48] sm:$0xff]  ;;  %s484_s13 = sshll.u32 %s260_s12, 3  ;;  %s378_s17 = scalar_lea.hbm %s851_s5, %s491_s14 }
  0x1f   : > { %s485_s25 = sshll.u32 %s264_s23, 3  ;;  %333 = vmatpush.msra.mxu1 %v330_v7  ;;  %v324_v15 = vld [vmem:[#allocation5 + $0x40] sm:$0xff]  ;;  %v323_v16 = vld [vmem:[#allocation5 + $0x38] sm:$0xff]  ;;  %v322_v17 = vld [vmem:[#allocation5 + $0x30] sm:$0xff]  ;;  %vm352_vm2 = vcmp.lt.s32.totalorder %v307_v25, 8  ;;  %s262_s23 = scalar_lea.vmem [#allocation7], %s484_s13 }
  0x20   : > { %s266_s6 = scalar_lea.vmem %s846_s0, %s485_s25  ;;  %s270_s9 = scalar_lea.vmem %s847_s1, %s485_s25  ;;  %298 = vmatpush.msra.mxu0 %v273_v4  ;;  %v321_v18 = vld [vmem:[#allocation5 + $0x28] sm:$0xff]  ;;  %v320_v19 = vld [vmem:[#allocation5 + $0x20] sm:$0xff]  ;;  %v319_v20 = vld [vmem:[#allocation5 + $0x18] sm:$0xff] }
  0x21   : > { %v304_v3 = vld [vmem:[%s266_s6] sm:$0xff]  ;;  %334 = vmatpush.msra.mxu1 %v329_v9  ;;  %v318_v21 = vld [vmem:[#allocation5 + $0x10] sm:$0xff]  ;;  %v317_v22 = vld [vmem:[#allocation5 + $0x8] sm:$0xff]  ;;  %s380_s25 = sshll.u32 %s262_s23, 4  ;;  %s382_s26 = sshll.u32 %s378_s17, 4  ;;  %s381_s25 = int_to_ptr.vmem [resolvable:$true] %s380_s25  ;;  %s383_s26 = int_to_ptr.hbm [resolvable:$true] %s382_s26 }
  0x22   : > { %v305_v5 = vmul.u32 8, %v304_v3  ;;  %v271_v10 = vld [vmem:[%s270_s9] sm:$0xff]  ;;  %299 = vmatpush.msra.mxu0 %v272_v8  ;;  %s368_s30 = scalar_lea.sflag [#allocation4], %s260_s12  ;;  %s637_s6 = sshra.s32 %s383_s26, 4  ;;  %s638_s6 = int_to_ptr.hbm [resolvable:$true] %s637_s6 }
  0x23   : > { %487 = vmatmul.msk.f32.vlgmr.msra.gmra.mxu0 %vm280_vm0, %v271_v10  ;;  %335 = vmatpush.msra.mxu1 %v328_v11  ;;  %v316_v23 = vld [vmem:[#allocation5] sm:$0xff]  ;;  %s639_s22 = scalar_lea.hbm %s638_s6, 8  ;;  %s643_s9 = scalar_lea.hbm %s851_s5, 16 }
  0x24   : > { %309 = vperm.xlu0 %557, %v305_v5   ;;  %v558_v29 = vld [vmem:[%s849_s3] ss:$0 sm:$0xff]  ;;  %p640_p0 = scmp.ne.s32.totalorder %s638_s6, %s639_s22  ;;  %p644_p3 = scmp.lt.s32.totalorder %s638_s6, %s851_s5 }
  0x25   : > { %336 = vmatpush.msra.mxu1 %v327_v12  ;;  %p645_p4 = scmp.lt.s32.totalorder %s643_s9, %s639_s22 }
  0x26   : > { %p641_p1 = pnand %p640_p0, %p768_p5 }
  0x27   : > { %337 = vmatpush.msra.mxu1 %v326_v13  ;;  %p646_p7 = por %p645_p4, %p644_p3 }
  0x28   : > { %p642_p2 = pneg %p641_p1 }
  0x29   : > { %338 = vmatpush.msra.mxu1 %v325_v14 }
  0x2a   : > { %p647_p8 = pnand %p646_p7, %p642_p2 }
  0x2b   : > { %339 = vmatpush.msra.mxu1 %v324_v15 }
  0x2d   : > { %340 = vmatpush.msra.mxu1 %v323_v16 }
  0x2f   : > { %341 = vmatpush.msra.mxu1 %v322_v17 }
  0x31   : > { %342 = vmatpush.msra.mxu1 %v321_v18 }
  0x33   : > { %343 = vmatpush.msra.mxu1 %v320_v19 }
  0x35   : > { %344 = vmatpush.msra.mxu1 %v319_v20 }
  0x37   : > { %345 = vmatpush.msra.mxu1 %v318_v21 }
  0x39   : > { %346 = vmatpush.msra.mxu1 %v317_v22 }
  0x3b   : > { %347 = vmatpush.msra.mxu1 %v316_v23 }
  0x96   : > { %v310_v26 = vpop.permute.xlu0 %309 }
  0x97   : > { %v311_v27 = vsub.s32 %v307_v25, %v310_v26 }
  0x99   : > { %v488_v28 = vxor.u32 2147483648, %v311_v27 }
  0x9b   : > { %vm314_vm1 = vcmp.lt.s32.totalorder %v488_v28, 2147483656 }
  0xa0   : > { %v301_v30 = vpop.f32.mrf.mxu0 }
  0xa1   : > { %v302_v31 = vadd.f32 %v558_v29, %v301_v30 }
  0xa3   : > { %489 = vmatmul.msk.f32.vlgmr.msra.gmra.mxu1 %vm314_vm1, %v302_v31 }
 0x120   : > { %v349_v32 = vpop.f32.mrf.mxu1 }
 0x121   : > { %v353_v33 = vsel %vm352_vm2, %v349_v32, -inf }
 0x122   : > { %354 = vmax.xlane.f32.xlu0 %v353_v33 }
 0x195   : > { %v355_v34 = vpop.xlane.xlu0 %354 }
 0x196   : > { %v356_v35 = vsub.f32 %v353_v33, %v355_v34 }
 0x198   : > { %v357_v36 = vmul.f32 1.442695, %v356_v35 }
 0x19a   : > { %559 = vpow2.f32 %v357_v36 }
 0x1a0   : > { %v560_v37 = vpop.eup %559 }
 0x1a1   : > { %359 = vadd.xlane.f32.xlu1 %v560_v37 }
 0x214   : > { %v360_v38 = vpop.xlane.xlu1 %359 }
 0x215   : > { %561 = vrcp.f32 %v360_v38 }
 0x21b   : > { %v562_v39 = vpop.eup %561 }
 0x21c   : > { %v362_v40 = vmul.f32 %v562_v39, %v360_v38 }
 0x21e   : > { %v363_v41 = vsub.f32 2.0, %v362_v40 }
 0x220   : > { %v364_v42 = vmul.f32 %v562_v39, %v363_v41 }
 0x222   : > { %v365_v43 = vmul.f32 %v560_v37, %v364_v42 }
 0x224   : > { %366 = vst [vmem:[%s262_s23] sm:$0xff] %v365_v43 }
 0x225   : > { %650 = shalt.err (!%p647_p8)
}
 0x226   : > { %502 = dma.vmem_to_hbm [thread:$0]  (%p768_p5), %s381_s25, 128, %s383_s26, %s368_s30  }
 0x227 PF: > { %p519_p9 = scmp.ge.s32.totalorder %s693_s21, 2  ;;  %s394_s12 = sand.u32 1, %s681_s18  }
 0x228   : > { %s395_s13 = scalar_lea.sflag [#allocation4], %s394_s12 }
 0x229   : > { %p512_p10 = pnand %p519_p9, %p772_p6 }
 0x22b   : > { %p513_p11 = pneg %p512_p10 }
 0x22d   : > { %676 = dma.done.wait (%p513_p11), %s395_s13, 128  }
 0x22e   : > { %678 = vsyncadd (%p513_p11), %s395_s13, 4294967168  ;;  %p17_p12 = scmp.ge.s32.totalorder %s755_s24, 4   ;;  %s855_s18 = smov %s685_s19 }
 0x22f   : > { %s856_s19 = smov %s689_s20  ;;  %s857_s20 = smov %s766_s27 }
 0x230   : > { %s858_s21 = smov %s755_s24  ;;  %19 = sbr.rel (!%p17_p12) target bundleno = 5 (0x5), region = 87 }
 0x235   :  { %401 = vsyncpa [#allocation3], 1 }
 0x236   :  { %403 = vsyncpa [#allocation3 + $0x1], 1 }
 0x237   :  { %404 = vsyncpa [#allocation6], 1 }
 0x238   :  { %405 = vsyncpa [#allocation4], 1 }
 0x239   :  { %407 = vsyncpa [#allocation4 + $0x1], 1 }

</bundles_post_ra>
